<compile_context>
chip_gen: v5e
topology: v5e:2x2
jax: 0.10.0
libtpu: 0.0.40
codegen_flags: <defaults>
</compile_context>

<pallas_src>
import functools

import jax
import jax.numpy as jnp
from jax.experimental import pallas as pl
from jax.experimental.pallas import tpu as pltpu

LANE = 128            # lanes per vreg (last dim)
ROW_ALIGN = 32        # row-block alignment (covers the (32,128) min tile of any dtype)
MAX_TILE_ROWS = 2048  # rows per block: 1 MiB f32 per input block, ~4 MiB double-buffered


def _round_down(x, m):
    return (x // m) * m


def _confusion_kernel(prob_ref, lab_ref, out_ref, *, valid_rows, tile_rows, need_mask):
    """Accumulate [pos_l, neg_l, TP, FP] as (8, LANE) int32 vregs in out_ref.

    out_ref : (4, 8, LANE) int32.  Its block index is constant across the grid,
    so it stays resident in VMEM and acts as the accumulator; the final
    cross-sublane/lane reduction happens in the JAX epilogue.
    """
    t = pl.program_id(0)

    @pl.when(t == 0)
    def _init():
        out_ref[...] = jnp.zeros_like(out_ref)

    prb = prob_ref[...]                      # (tile_rows, LANE), native dtype
    lab = lab_ref[...]                       # (tile_rows, LANE), native dtype

    pred_pos = prb >= 0.5                    # False for NaN probs
    lab_pos = lab == 1                       # exact equality, as in the original
    lab_neg = lab == 0                       # padding (-1) matches neither bucket

    if need_mask:
        # The last row-block extends past the array; mask out garbage rows.
        row_ids = jax.lax.broadcasted_iota(jnp.int32, (tile_rows, LANE), 0)
        row_ok = row_ids < (valid_rows - t * tile_rows)
        lab_pos = jnp.logical_and(lab_pos, row_ok)
        lab_neg = jnp.logical_and(lab_neg, row_ok)

    def vreg_count(mask):
        # (tile_rows, LANE) bool -> (8, LANE) int32 partial counts.  Pure VALU
        # adds over sublane groups; no cross-lane/XLU work in the hot loop.
        return jnp.sum(mask.astype(jnp.int32).reshape(-1, 8, LANE), axis=0)

    out_ref[0] += vreg_count(lab_pos)                              # pos_l
    out_ref[1] += vreg_count(lab_neg)                              # neg_l
    out_ref[2] += vreg_count(jnp.logical_and(pred_pos, lab_pos))   # TP
    out_ref[3] += vreg_count(jnp.logical_and(pred_pos, lab_neg))   # FP


@jax.jit
def confusion_counts(prob, labels):
    """Pallas-computed [pos_l, neg_l, TP, TN, FN, FP] (int32) for 1-D inputs."""
    n = prob.shape[0]
    if labels.dtype == jnp.bool_:
        labels = labels.astype(jnp.int32)    # bool can't carry the -1 pad marker

    rows = -(-n // LANE)                     # cdiv(n, LANE)
    rows_p = max(rows, ROW_ALIGN)            # at least one aligned row-block
    pad = rows_p * LANE - n
    if pad:
        # Hit only when N % 128 != 0 or N < ROW_ALIGN*128; padded labels are -1
        # so padded elements contribute nothing.
        # TODO(synk): for huge non-128-multiple N, count the <128-element tail
        # separately instead of a full pad copy of the inputs.
        prob = jnp.pad(prob, (0, pad))
        labels = jnp.pad(labels, (0, pad), constant_values=-1)
    prob2d = prob.reshape(rows_p, LANE)
    lab2d = labels.reshape(rows_p, LANE)

    tile_rows = min(MAX_TILE_ROWS, _round_down(rows_p, ROW_ALIGN))
    num_tiles = -(-rows_p // tile_rows)
    need_mask = (rows_p % tile_rows) != 0    # static; masked code only if needed

    kernel = functools.partial(
        _confusion_kernel, valid_rows=rows_p, tile_rows=tile_rows, need_mask=need_mask)

    bytes_accessed = (rows_p * LANE * (jnp.dtype(prob2d.dtype).itemsize
                                       + jnp.dtype(lab2d.dtype).itemsize)
                      + 4 * 8 * LANE * 4)

    counts = pl.pallas_call(
        kernel,
        out_shape=jax.ShapeDtypeStruct((4, 8, LANE), jnp.int32),
        grid_spec=pltpu.PrefetchScalarGridSpec(
            num_scalar_prefetch=0,
            grid=(num_tiles,),
            in_specs=[
                pl.BlockSpec((tile_rows, LANE), lambda t: (t, 0)),
                pl.BlockSpec((tile_rows, LANE), lambda t: (t, 0)),
            ],
            out_specs=pl.BlockSpec((4, 8, LANE), lambda t: (0, 0, 0)),
        ),
        compiler_params=pltpu.CompilerParams(
            dimension_semantics=("arbitrary",)),
        cost_estimate=pl.CostEstimate(
            flops=0, transcendentals=0, bytes_accessed=bytes_accessed),
    )(prob2d, lab2d)

    vals = counts.sum(axis=(1, 2))           # (4,) int32, exact
    pos_l, neg_l, tp, fp = vals[0], vals[1], vals[2], vals[3]
    tn = neg_l - fp                          # lab==0 & ~(prob>=0.5)
    fn = pos_l - tp                          # lab==1 & ~(prob>=0.5)
    return jnp.stack([pos_l, neg_l, tp, tn, fn, fp])


def _safe_div(num, den):
    num = jnp.asarray(num, jnp.float32)
    den = jnp.asarray(den, jnp.float32)
    return jnp.where(den > 0, num / jnp.where(den > 0, den, 1.0), jnp.float32(0.0))


class Loss:
    """JAX/Pallas mirror of the PyTorch Loss module's forward pass.

    The confusion-matrix reductions (the only real tensor compute in
    Loss.forward) run in the Pallas kernel; threshold metrics are derived from
    those counts.  Like the original, forward() returns (1, 2, 3); the derived
    metrics are also returned for inspection.
    """

    def __init__(self, device=None, curve=False, acc=True, ppv=True,
                 sensi=True, tnr=True, npv=True, auroc=False, aurocPlot=False,
                 auprc=False, auprcPlot=False, callb=False, callbPlot=False):
        self.device = device
        self.curve = curve          # TODO(synk): dcurves decision-curve analysis not translatable
        self.acc = acc
        self.ppv = ppv
        self.sensi = sensi
        self.tnr = tnr
        self.npv = npv
        self.auroc = auroc          # TODO(synk): sklearn roc_curve/auc has no Pallas equivalent
        self.aurocPlot = aurocPlot  # TODO(synk): matplotlib plotting not translatable
        self.auprc = auprc          # TODO(synk): precision_recall_curve has no Pallas equivalent
        self.auprcPlot = auprcPlot
        self.callb = callb          # TODO(synk): calibration binning/plots not translated
        self.callbPlot = callbPlot

    def forward(self, prob, labels, logits, ob):
        n = prob.shape[0]
        counts = confusion_counts(prob, labels)
        pos_l, neg_l, tp, tn, fn, fp = (counts[0], counts[1], counts[2],
                                        counts[3], counts[4], counts[5])

        metrics = {
            "pos_l": pos_l, "neg_l": neg_l,
            "tp": tp, "tn": tn, "fn": fn, "fp": fp,
        }
        if self.acc:
            metrics["accuracy"] = (tp + tn).astype(jnp.float32) / n
        if self.ppv:
            metrics["precision"] = _safe_div(tp, tp + fp)
        if self.sensi:
            metrics["recall"] = _safe_div(tp, tp + fn)
        if self.tnr:
            metrics["specificity"] = _safe_div(tn, tn + fp)
        if self.npv:
            metrics["npv"] = _safe_div(tn, tn + fn)

        return (1, 2, 3), metrics


def _reference_counts(prob, labels):
    """Pure-JAX reference for verification."""
    prob1 = prob >= 0.5
    lab1 = labels == 1
    lab0 = labels == 0
    i32 = lambda m: jnp.sum(m).astype(jnp.int32)
    tp = i32(prob1 & lab1)
    tn = i32(~prob1 & lab0)
    fn = i32(~prob1 & lab1)
    fp = i32(prob1 & lab0)
    return jnp.stack([i32(lab1), i32(lab0), tp, tn, fn, fp])


if __name__ == "__main__":
    key = jax.random.PRNGKey(0)

    # Verify the kernel against a pure-JAX reference on a few sizes that hit
    # the different tiling paths (padded tiny case, partial last block + lane
    # remainder, perfectly divisible case).
    for n in (256, 1337, 4096):
        k1, k2 = jax.random.split(jax.random.fold_in(key, n))
        prob = jax.random.uniform(k1, (n,), dtype=jnp.float32)
        labels = (jax.random.uniform(k2, (n,)) < 0.4).astype(jnp.float32)
        got = confusion_counts(prob, labels)
        want = _reference_counts(prob, labels)
        jax.block_until_ready((got, want))
        assert jnp.array_equal(got, want), (n, got, want)

    # Run the full forward pass once on a small 1-D prob/label vector,
    # consistent with the module's inputs.
    N = 256
    k1, k2 = jax.random.split(key)
    prob = jax.random.uniform(k1, (N,), dtype=jnp.float32)
    labels = (jax.random.uniform(k2, (N,)) < 0.4).astype(jnp.float32)
    logits = prob * 2.0 - 1.0   # unused by the translated path
    ob = labels                 # unused by the translated path

    loss = Loss(device=None, curve=False, acc=True, ppv=True, sensi=True,
                tnr=True, npv=True, auroc=False, aurocPlot=False,
                auprc=False, auprcPlot=False, callb=False, callbPlot=False)
    ret, metrics = loss.forward(prob, labels, logits, ob)
    jax.block_until_ready(metrics)
    assert ret == (1, 2, 3)

    print("KERNEL_OK")
</pallas_src>

<mosaic_0001>
module attributes {stable_mosaic.version = 11 : i64} {
  func.func @_confusion_kernel(%arg0: i32, %arg1: memref<32x128xf32, #tpu.memory_space<vmem>>, %arg2: memref<32x128xf32, #tpu.memory_space<vmem>>, %arg3: memref<4x8x128xi32, #tpu.memory_space<vmem>>) attributes {dimension_semantics = [#tpu.dimension_semantics<arbitrary>], iteration_bounds = array<i64: 1>, scalar_prefetch = 0 : i64, scratch_operands = 0 : i64, tpu.core_type = #tpu.core_type<tc>, window_params = [{transform_indices = @transform_0, window_bounds = array<i64: 32, 128>}, {transform_indices = @transform_1, window_bounds = array<i64: 32, 128>}, {pipeline_mode = #tpu.pipeline_mode<synchronous>, transform_indices = @transform_2, window_bounds = array<i64: 4, 8, 128>}]} {
    %c0_i32 = arith.constant 0 : i32
    %0 = arith.cmpi eq, %arg0, %c0_i32 : i32
    %1 = arith.extui %0 : i1 to i32
    %c0_i32_0 = arith.constant 0 : i32
    %2 = arith.cmpi ne, %1, %c0_i32_0 : i32
    scf.if %2 {
      %c0_i32_31 = arith.constant 0 : i32
      %49 = vector.broadcast %c0_i32_31 : i32 to vector<4x8x128xi32>
      %c0_32 = arith.constant 0 : index
      %c0_33 = arith.constant 0 : index
      %c0_34 = arith.constant 0 : index
      %50 = vector.load %arg3[%c0_32, %c0_33, %c0_34] : memref<4x8x128xi32, #tpu.memory_space<vmem>>, vector<4x8x128xi32>
      tpu.vector_store %arg3[%c0_32, %c0_33, %c0_34], %49 {strides = array<i32>} : memref<4x8x128xi32, #tpu.memory_space<vmem>>, vector<4x8x128xi32>,
    } else {
    }
    %c0 = arith.constant 0 : index
    %c0_1 = arith.constant 0 : index
    %3 = vector.load %arg1[%c0, %c0_1] : memref<32x128xf32, #tpu.memory_space<vmem>>, vector<32x128xf32>
    %c0_2 = arith.constant 0 : index
    %c0_3 = arith.constant 0 : index
    %4 = vector.load %arg2[%c0_2, %c0_3] : memref<32x128xf32, #tpu.memory_space<vmem>>, vector<32x128xf32>
    %cst = arith.constant 5.000000e-01 : f32
    %5 = vector.broadcast %cst : f32 to vector<32x128xf32>
    %6 = arith.cmpf oge, %3, %5 : vector<32x128xf32>
    %cst_4 = arith.constant 1.000000e+00 : f32
    %7 = vector.broadcast %cst_4 : f32 to vector<32x128xf32>
    %8 = arith.cmpf oeq, %4, %7 : vector<32x128xf32>
    %cst_5 = arith.constant 0.000000e+00 : f32
    %9 = vector.broadcast %cst_5 : f32 to vector<32x128xf32>
    %10 = arith.cmpf oeq, %4, %9 : vector<32x128xf32>
    %c0_6 = arith.constant 0 : index
    %c0_7 = arith.constant 0 : index
    %c0_8 = arith.constant 0 : index
    %11 = vector.load %arg3[%c0_6, %c0_7, %c0_8] : memref<4x8x128xi32, #tpu.memory_space<vmem>>, vector<1x8x128xi32>
    %12 = vector.shape_cast %11 : vector<1x8x128xi32> to vector<8x128xi32>
    %13 = arith.extui %8 : vector<32x128xi1> to vector<32x128xi32>
    %14 = vector.shape_cast %13 : vector<32x128xi32> to vector<4x8x128xi32>
    %cst_9 = arith.constant dense<0> : vector<8x128xi32>
    %15 = vector.multi_reduction <add>, %14, %cst_9 [0] : vector<4x8x128xi32> to vector<8x128xi32>
    %16 = arith.addi %12, %15 : vector<8x128xi32>
    %c0_10 = arith.constant 0 : index
    %c0_11 = arith.constant 0 : index
    %c0_12 = arith.constant 0 : index
    %17 = vector.load %arg3[%c0_10, %c0_11, %c0_12] : memref<4x8x128xi32, #tpu.memory_space<vmem>>, vector<1x8x128xi32>
    %18 = vector.shape_cast %17 : vector<1x8x128xi32> to vector<8x128xi32>
    %19 = vector.shape_cast %16 : vector<8x128xi32> to vector<1x8x128xi32>
    tpu.vector_store %arg3[%c0_10, %c0_11, %c0_12], %19 {strides = array<i32>} : memref<4x8x128xi32, #tpu.memory_space<vmem>>, vector<1x8x128xi32>,
    %c1 = arith.constant 1 : index
    %c0_13 = arith.constant 0 : index
    %c0_14 = arith.constant 0 : index
    %20 = vector.load %arg3[%c1, %c0_13, %c0_14] : memref<4x8x128xi32, #tpu.memory_space<vmem>>, vector<1x8x128xi32>
    %21 = vector.shape_cast %20 : vector<1x8x128xi32> to vector<8x128xi32>
    %22 = arith.extui %10 : vector<32x128xi1> to vector<32x128xi32>
    %23 = vector.shape_cast %22 : vector<32x128xi32> to vector<4x8x128xi32>
    %cst_15 = arith.constant dense<0> : vector<8x128xi32>
    %24 = vector.multi_reduction <add>, %23, %cst_15 [0] : vector<4x8x128xi32> to vector<8x128xi32>
    %25 = arith.addi %21, %24 : vector<8x128xi32>
    %c1_16 = arith.constant 1 : index
    %c0_17 = arith.constant 0 : index
    %c0_18 = arith.constant 0 : index
    %26 = vector.load %arg3[%c1_16, %c0_17, %c0_18] : memref<4x8x128xi32, #tpu.memory_space<vmem>>, vector<1x8x128xi32>
    %27 = vector.shape_cast %26 : vector<1x8x128xi32> to vector<8x128xi32>
    %28 = vector.shape_cast %25 : vector<8x128xi32> to vector<1x8x128xi32>
    tpu.vector_store %arg3[%c1_16, %c0_17, %c0_18], %28 {strides = array<i32>} : memref<4x8x128xi32, #tpu.memory_space<vmem>>, vector<1x8x128xi32>,
    %c2 = arith.constant 2 : index
    %c0_19 = arith.constant 0 : index
    %c0_20 = arith.constant 0 : index
    %29 = vector.load %arg3[%c2, %c0_19, %c0_20] : memref<4x8x128xi32, #tpu.memory_space<vmem>>, vector<1x8x128xi32>
    %30 = vector.shape_cast %29 : vector<1x8x128xi32> to vector<8x128xi32>
    %31 = arith.andi %6, %8 : vector<32x128xi1>
    %32 = arith.extui %31 : vector<32x128xi1> to vector<32x128xi32>
    %33 = vector.shape_cast %32 : vector<32x128xi32> to vector<4x8x128xi32>
    %cst_21 = arith.constant dense<0> : vector<8x128xi32>
    %34 = vector.multi_reduction <add>, %33, %cst_21 [0] : vector<4x8x128xi32> to vector<8x128xi32>
    %35 = arith.addi %30, %34 : vector<8x128xi32>
    %c2_22 = arith.constant 2 : index
    %c0_23 = arith.constant 0 : index
    %c0_24 = arith.constant 0 : index
    %36 = vector.load %arg3[%c2_22, %c0_23, %c0_24] : memref<4x8x128xi32, #tpu.memory_space<vmem>>, vector<1x8x128xi32>
    %37 = vector.shape_cast %36 : vector<1x8x128xi32> to vector<8x128xi32>
    %38 = vector.shape_cast %35 : vector<8x128xi32> to vector<1x8x128xi32>
    tpu.vector_store %arg3[%c2_22, %c0_23, %c0_24], %38 {strides = array<i32>} : memref<4x8x128xi32, #tpu.memory_space<vmem>>, vector<1x8x128xi32>,
    %c3 = arith.constant 3 : index
    %c0_25 = arith.constant 0 : index
    %c0_26 = arith.constant 0 : index
    %39 = vector.load %arg3[%c3, %c0_25, %c0_26] : memref<4x8x128xi32, #tpu.memory_space<vmem>>, vector<1x8x128xi32>
    %40 = vector.shape_cast %39 : vector<1x8x128xi32> to vector<8x128xi32>
    %41 = arith.andi %6, %10 : vector<32x128xi1>
    %42 = arith.extui %41 : vector<32x128xi1> to vector<32x128xi32>
    %43 = vector.shape_cast %42 : vector<32x128xi32> to vector<4x8x128xi32>
    %cst_27 = arith.constant dense<0> : vector<8x128xi32>
    %44 = vector.multi_reduction <add>, %43, %cst_27 [0] : vector<4x8x128xi32> to vector<8x128xi32>
    %45 = arith.addi %40, %44 : vector<8x128xi32>
    %c3_28 = arith.constant 3 : index
    %c0_29 = arith.constant 0 : index
    %c0_30 = arith.constant 0 : index
    %46 = vector.load %arg3[%c3_28, %c0_29, %c0_30] : memref<4x8x128xi32, #tpu.memory_space<vmem>>, vector<1x8x128xi32>
    %47 = vector.shape_cast %46 : vector<1x8x128xi32> to vector<8x128xi32>
    %48 = vector.shape_cast %45 : vector<8x128xi32> to vector<1x8x128xi32>
    tpu.vector_store %arg3[%c3_28, %c0_29, %c0_30], %48 {strides = array<i32>} : memref<4x8x128xi32, #tpu.memory_space<vmem>>, vector<1x8x128xi32>,
    return
  }
  func.func @transform_0(%arg0: i32) -> (i32, i32) {
    %c0_i32 = arith.constant 0 : i32
    %c0_i32_0 = arith.constant 0 : i32
    return %arg0, %c0_i32 : i32, i32
  }
  func.func @transform_1(%arg0: i32) -> (i32, i32) {
    %c0_i32 = arith.constant 0 : i32
    %c0_i32_0 = arith.constant 0 : i32
    return %arg0, %c0_i32 : i32, i32
  }
  func.func @transform_2(%arg0: i32) -> (i32, i32, i32) {
    %c0_i32 = arith.constant 0 : i32
    %c0_i32_0 = arith.constant 0 : i32
    %c0_i32_1 = arith.constant 0 : i32
    %c0_i32_2 = arith.constant 0 : i32
    return %c0_i32, %c0_i32_0, %c0_i32_1 : i32, i32, i32
  }
}

</mosaic_0001>

<bundles_post_ra>
// kernel: confusion_counts.1
= control target key start
LH: loop header
LB: loop body
LE: loop exit
PB: predicated region body
PF: predicated region fallthrough
CT: control target
= control target key end

     0   :  { %v101_v4 = vmov 0   ;;  %s177_s1 = inlined_call_operand.vmem [shape: f32[32,128], index: 1, kind: input, shape index: {}]   ;;  %s178_s0 = inlined_call_operand.vmem [shape: f32[32,128], index: 0, kind: input, shape index: {}]   ;;  %s179_s2 = inlined_call_operand.vmem [shape: s32[4,8,128], index: 2, kind: output, shape index: {}]  }
   0x1   :  { %v23_v0 = vld [vmem:[%s177_s1] sm:$0xff]  ;;  %v24_v1 = vld [vmem:[%s177_s1 + $0x8] sm:$0xff]  ;;  %v25_v2 = vld [vmem:[%s177_s1 + $0x10] sm:$0xff] }
   0x2   :  { %v26_v3 = vld [vmem:[%s177_s1 + $0x18] sm:$0xff]  ;;  %vm31_vm0 = vcmp.eq.f32.partialorder %v23_v0, 1.0  ;;  %vm32_vm1 = vcmp.eq.f32.partialorder %v24_v1, 1.0  ;;  %vm33_vm2 = vcmp.eq.f32.partialorder %v25_v2, 1.0  ;;  %vm35_vm3 = vcmp.eq.f32.partialorder %v23_v0, 0.0  ;;  %v19_v8 = vld [vmem:[%s178_s0] sm:$0xff] }
   0x3   :  { %vm34_vm4 = vcmp.eq.f32.partialorder %v26_v3, 1.0  ;;  %v40_v5 = vsel %vm31_vm0, 1, %v101_v4  ;;  %v41_v6 = vsel %vm32_vm1, 1, %v101_v4  ;;  %v42_v7 = vsel %vm33_vm2, 1, %v101_v4  ;;  %v20_v11 = vld [vmem:[%s178_s0 + $0x8] sm:$0xff]  ;;  %v21_v12 = vld [vmem:[%s178_s0 + $0x10] sm:$0xff] }
   0x4   :  { %v43_v9 = vsel %vm34_vm4, 1, %v101_v4  ;;  %v44_v10 = vadd.s32 %v41_v6, %v40_v5  ;;  %vm36_vm5 = vcmp.eq.f32.partialorder %v24_v1, 0.0  ;;  %vm37_vm6 = vcmp.eq.f32.partialorder %v25_v2, 0.0  ;;  %v22_v16 = vld [vmem:[%s178_s0 + $0x18] sm:$0xff] }
   0x5   :  { %v45_v13 = vadd.s32 %v43_v9, %v42_v7  ;;  %vm38_vm7 = vcmp.eq.f32.partialorder %v26_v3, 0.0  ;;  %v51_v14 = vsel %vm35_vm3, 1, %v101_v4  ;;  %v52_v15 = vsel %vm36_vm5, 1, %v101_v4 }
   0x6   :  { %v53_v17 = vsel %vm37_vm6, 1, %v101_v4  ;;  %v54_v18 = vsel %vm38_vm7, 1, %v101_v4  ;;  %v55_v19 = vadd.s32 %v52_v15, %v51_v14  ;;  %vm27_vm8 = vcmp.ge.f32.partialorder %v19_v8, 0.5 }
   0x7   :  { %v46_v20 = vadd.s32 %v45_v13, %v44_v10  ;;  %v56_v21 = vadd.s32 %v54_v18, %v53_v17  ;;  %vm28_vm9 = vcmp.ge.f32.partialorder %v20_v11, 0.5  ;;  %vm29_vm10 = vcmp.ge.f32.partialorder %v21_v12, 0.5  ;;  %vm62_vm11 = vmand %vm27_vm8, %vm31_vm0 }
   0x8   :  { %vm30_vm12 = vcmp.ge.f32.partialorder %v22_v16, 0.5  ;;  %vm63_vm13 = vmand %vm28_vm9, %vm32_vm1  ;;  %v66_v22 = vsel %vm62_vm11, 1, %v101_v4 }
   0x9   :  { %v57_v23 = vadd.s32 %v56_v21, %v55_v19  ;;  %vm64_vm14 = vmand %vm29_vm10, %vm33_vm2  ;;  %v67_v24 = vsel %vm63_vm13, 1, %v101_v4  ;;  %48 = vst [vmem:[%s179_s2] sm:$0xff] %v46_v20 }
   0xa   :  { %vm65_vm15 = vmand %vm30_vm12, %vm34_vm4  ;;  %v68_v25 = vsel %vm64_vm14, 1, %v101_v4  ;;  %v70_v26 = vadd.s32 %v67_v24, %v66_v22 }
   0xb   :  { %v69_v27 = vsel %vm65_vm15, 1, %v101_v4  ;;  %vm77_vm0 = vmand %vm27_vm8, %vm35_vm3  ;;  %95 = vst [vmem:[%s179_s2 + $0x8] sm:$0xff] %v57_v23 }
   0xc   :  { %v71_v28 = vadd.s32 %v69_v27, %v68_v25  ;;  %vm78_vm1 = vmand %vm28_vm9, %vm36_vm5  ;;  %v81_v29 = vsel %vm77_vm0, 1, %v101_v4 }
   0xd   :  { %vm79_vm2 = vmand %vm29_vm10, %vm37_vm6  ;;  %v82_v30 = vsel %vm78_vm1, 1, %v101_v4 }
   0xe   :  { %v72_v31 = vadd.s32 %v71_v28, %v70_v26  ;;  %vm80_vm4 = vmand %vm30_vm12, %vm38_vm7  ;;  %v83_v32 = vsel %vm79_vm2, 1, %v101_v4  ;;  %v85_v33 = vadd.s32 %v82_v30, %v81_v29 }
   0xf   :  { %v84_v34 = vsel %vm80_vm4, 1, %v101_v4 }
  0x10   :  { %v86_v35 = vadd.s32 %v84_v34, %v83_v32  ;;  %97 = vst [vmem:[%s179_s2 + $0x10] sm:$0xff] %v72_v31 }
  0x12   :  { %v87_v36 = vadd.s32 %v86_v35, %v85_v33 }
  0x14   :  { %99 = vst [vmem:[%s179_s2 + $0x18] sm:$0xff] %v87_v36 }

</bundles_post_ra>
